<compile_context>
chip_gen: v5e
topology: v5e:2x2
jax: 0.10.0
libtpu: 0.0.40
codegen_flags: <defaults>
</compile_context>

<pallas_src>
import jax
import jax.numpy as jnp
from jax.experimental import pallas as pl
from jax.experimental.pallas import tpu as pltpu


def _round_up(x, m):
    return ((x + m - 1) // m) * m


# ---------------------------------------------------------------------------
# Kernels
# ---------------------------------------------------------------------------
def _linear_single_block_kernel(x_ref, w_ref, o_ref):
    # x_ref: (B, F), w_ref: (F, C) -- weight already transposed in the wrapper,
    # so this is a plain last-dim contraction straight into the MXU.
    o_ref[...] = jnp.dot(
        x_ref[...], w_ref[...], preferred_element_type=jnp.float32
    ).astype(o_ref.dtype)


def _linear_tiled_kernel(x_ref, w_ref, o_ref, acc_ref):
    # Grid = (M // tm, N // tn, K // tk); K (features) is the reduction axis.
    @pl.when(pl.program_id(2) == 0)
    def _init():
        acc_ref[...] = jnp.zeros_like(acc_ref)

    acc_ref[...] += jnp.dot(
        x_ref[...], w_ref[...], preferred_element_type=jnp.float32
    )

    @pl.when(pl.program_id(2) == pl.num_programs(2) - 1)
    def _finalize():
        o_ref[...] = acc_ref[...].astype(o_ref.dtype)


# ---------------------------------------------------------------------------
# Wrapper
# ---------------------------------------------------------------------------
def linear_regression_forward(x, weight, *, tm=128, tn=128, tk=256):
    """Forward of LinearRegression: x @ weight.T (bias=False).

    x:      (batch, numfeat)
    weight: (numclass, numfeat)   (PyTorch nn.Linear layout)
    returns (batch, numclass)
    """
    B, F = x.shape
    C, F2 = weight.shape
    assert F == F2, "feature dims must match"
    out_dtype = x.dtype

    # One-time layout change outside the kernel: (numclass, numfeat) -> (F, C).
    w_t = weight.T

    use_tiled = (B >= tm) and (C >= tn) and (F >= tk)

    if not use_tiled:
        # Tiny-shape path: one straight-line block, lane-dense padded output.
        Bp = _round_up(B, 8)       # sublane alignment
        Fp = _round_up(F, 128)     # lane-aligned contraction dim
        Cp = _round_up(C, 128)     # lane-dense output -> unmasked full stores
        x_p = jnp.pad(x, ((0, Bp - B), (0, Fp - F)))
        w_p = jnp.pad(w_t, ((0, Fp - F), (0, Cp - C)))

        out_p = pl.pallas_call(
            _linear_single_block_kernel,
            out_shape=jax.ShapeDtypeStruct((Bp, Cp), out_dtype),
            in_specs=[
                pl.BlockSpec(memory_space=pltpu.MemorySpace.VMEM),
                pl.BlockSpec(memory_space=pltpu.MemorySpace.VMEM),
            ],
            out_specs=pl.BlockSpec(memory_space=pltpu.MemorySpace.VMEM),
            cost_estimate=pl.CostEstimate(
                flops=2 * Bp * Fp * Cp,
                transcendentals=0,
                bytes_accessed=4 * (Bp * Fp + Fp * Cp + Bp * Cp),
            ),
        )(x_p, w_p)
    else:
        # Tiled path: (M, N, K) grid with f32 accumulator, reduction axis last.
        Bp = _round_up(B, tm)
        Cp = _round_up(C, tn)
        Fp = _round_up(F, tk)
        x_p = jnp.pad(x, ((0, Bp - B), (0, Fp - F)))
        w_p = jnp.pad(w_t, ((0, Fp - F), (0, Cp - C)))

        grid = (Bp // tm, Cp // tn, Fp // tk)
        out_p = pl.pallas_call(
            _linear_tiled_kernel,
            out_shape=jax.ShapeDtypeStruct((Bp, Cp), out_dtype),
            grid_spec=pltpu.PrefetchScalarGridSpec(
                num_scalar_prefetch=0,
                grid=grid,
                in_specs=[
                    pl.BlockSpec((tm, tk), lambda i, j, k: (i, k)),
                    pl.BlockSpec((tk, tn), lambda i, j, k: (k, j)),
                ],
                out_specs=pl.BlockSpec((tm, tn), lambda i, j, k: (i, j)),
                scratch_shapes=[pltpu.VMEM((tm, tn), jnp.float32)],
            ),
            compiler_params=pltpu.CompilerParams(
                dimension_semantics=("parallel", "parallel", "arbitrary"),
            ),
            cost_estimate=pl.CostEstimate(
                flops=2 * Bp * Fp * Cp,
                transcendentals=0,
                bytes_accessed=4 * (Bp * Fp + Fp * Cp + Bp * Cp),
            ),
        )(x_p, w_p)

    return out_p[:B, :C]


if __name__ == "__main__":
    # Module config: numfeat=32, numclass=16, bias=False
    numfeat, numclass, batch = 32, 16, 8

    key = jax.random.PRNGKey(0)
    kx, kw = jax.random.split(key)

    x = jax.random.normal(kx, (batch, numfeat), dtype=jnp.float32)
    # Deterministic init mimicking nn.Linear default (uniform in +-1/sqrt(numfeat))
    bound = 1.0 / (numfeat ** 0.5)
    weight = jax.random.uniform(
        kw, (numclass, numfeat), minval=-bound, maxval=bound, dtype=jnp.float32
    )

    out = linear_regression_forward(x, weight)
    out = jax.block_until_ready(out)

    ref = x @ weight.T
    assert out.shape == (batch, numclass)
    assert jnp.allclose(out, ref, atol=1e-5, rtol=1e-5)

    # Also exercise the scaled/tiled path once (modest shapes, grid = (2, 2, 2)).
    kx2, kw2 = jax.random.split(jax.random.PRNGKey(1))
    xb = jax.random.normal(kx2, (256, 512), dtype=jnp.float32)
    wb = jax.random.normal(kw2, (256, 512), dtype=jnp.float32) * 0.05
    outb = jax.block_until_ready(linear_regression_forward(xb, wb))
    refb = jnp.dot(xb, wb.T, precision=jax.lax.Precision.HIGHEST)
    assert outb.shape == (256, 256)
    assert jnp.allclose(outb, refb, atol=2e-2, rtol=2e-2)

    print("KERNEL_OK")
</pallas_src>

<mosaic_0001>
module attributes {stable_mosaic.version = 11 : i64} {
  func.func @_linear_single_block_kernel(%arg0: memref<8x128xf32, #tpu.memory_space<vmem>>, %arg1: memref<128x128xf32, #tpu.memory_space<vmem>>, %arg2: memref<8x128xf32, #tpu.memory_space<vmem>>) attributes {dimension_semantics = [], scalar_prefetch = 0 : i64, scratch_operands = 0 : i64, tpu.core_type = #tpu.core_type<tc>} {
    %c0 = arith.constant 0 : index
    %c0_0 = arith.constant 0 : index
    %0 = vector.load %arg0[%c0, %c0_0] : memref<8x128xf32, #tpu.memory_space<vmem>>, vector<8x128xf32>
    %c0_1 = arith.constant 0 : index
    %c0_2 = arith.constant 0 : index
    %1 = vector.load %arg1[%c0_1, %c0_2] : memref<128x128xf32, #tpu.memory_space<vmem>>, vector<128x128xf32>
    %cst = arith.constant dense<0.000000e+00> : vector<8x128xf32>
    %2 = tpu.matmul %0, %1, %cst {dimension_numbers = #tpu.dot_dimension_numbers<[1], [0], [0], [1], [0, 0, 1, 1], [], []>} : vector<8x128xf32>, vector<128x128xf32>, vector<8x128xf32> -> vector<8x128xf32>
    %c0_3 = arith.constant 0 : index
    %c0_4 = arith.constant 0 : index
    %3 = vector.load %arg2[%c0_3, %c0_4] : memref<8x128xf32, #tpu.memory_space<vmem>>, vector<8x128xf32>
    tpu.vector_store %arg2[%c0_3, %c0_4], %2 {strides = array<i32>} : memref<8x128xf32, #tpu.memory_space<vmem>>, vector<8x128xf32>,
    return
  }
}

</mosaic_0001>

<bundles_post_ra>
// kernel: tpu_custom_call.1
= control target key start
LH: loop header
LB: loop body
LE: loop exit
PB: predicated region body
PF: predicated region fallthrough
CT: control target
= control target key end

     0   :  { %7 = vsyncpa [#allocation3], 0  ;;  %s210_s0 = inlined_call_operand.hbm [shape: f32[8,128], index: 0, kind: input, shape index: {}]   ;;  %s211_s1 = inlined_call_operand.hbm [shape: f32[128,128], index: 1, kind: input, shape index: {}]   ;;  %s212_s2 = inlined_call_operand.hbm [shape: f32[8,128], index: 2, kind: output, shape index: {}]  }
   0x1   :  { %8 = vsyncpa [#allocation6], 0 }
   0x2   :  { %9 = vsyncpa [#allocation4], 0  ;;  %s15_s11 = sshll.u32 %s210_s0, 4  ;;  %s181_s12 = smov [#allocation2]   ;;  %s16_s11 = int_to_ptr.hbm [resolvable:$true] %s15_s11 }
   0x3   :  { %s17_s13 = sshll.u32 %s181_s12, 4  ;;  %s25_s16 = sshll.u32 %s211_s1, 4  ;;  %s18_s13 = int_to_ptr.vmem [resolvable:$true] %s17_s13  ;;  %s26_s16 = int_to_ptr.hbm [resolvable:$true] %s25_s16 }
   0x4   :  { %20 = dma.hbm_to_vmem [thread:$0]  %s16_s11, 128, %s18_s13, [#allocation3]  }
   0x5   :  { %s182_s17 = smov [#allocation5]   ;;  %s183_s19 = smov 128  }
   0x6   :  { %s27_s18 = sshll.u32 %s182_s17, 4  ;;  %s184_s20 = smov 8   ;;  %s28_s18 = int_to_ptr.vmem [resolvable:$true] %s27_s18 }
   0x7   :  { %33 = dma.hbm_to_vmem [thread:$0]  %s26_s16, 2048, %s28_s18, [#allocation6], %s183_s19, %s183_s19, %s184_s20  }
   0x8   :  { %175 = dma.done.wait [#allocation3], 128  }
   0x9   :  { %176 = vsyncadd [#allocation3], 4294967168 }
   0xa   :  { %177 = dma.done.wait [#allocation6], 2048  }
   0xb   :  { %178 = vsyncadd [#allocation6], 4294965248  ;;  %v58_v0 = vld [vmem:[#allocation5 + $0x78] sm:$0xff]  ;;  %v57_v1 = vld [vmem:[#allocation5 + $0x70] sm:$0xff]  ;;  %s185_s0 = smov [#allocation7]   ;;  %s87_s23 = sshll.u32 %s212_s2, 4  ;;  %s88_s23 = int_to_ptr.hbm [resolvable:$true] %s87_s23 }
   0xc   :  { %59 = vmatpush.msra.mxu0 %v58_v0  ;;  %v56_v2 = vld [vmem:[#allocation5 + $0x68] sm:$0xff]  ;;  %v55_v3 = vld [vmem:[#allocation5 + $0x60] sm:$0xff]  ;;  %v54_v4 = vld [vmem:[#allocation5 + $0x58] sm:$0xff]  ;;  %s85_s1 = sshll.u32 %s185_s0, 4  ;;  %s86_s1 = int_to_ptr.vmem [resolvable:$true] %s85_s1 }
   0xd   :  { %v53_v5 = vld [vmem:[#allocation5 + $0x50] sm:$0xff]  ;;  %v52_v6 = vld [vmem:[#allocation5 + $0x48] sm:$0xff]  ;;  %v51_v7 = vld [vmem:[#allocation5 + $0x40] sm:$0xff] }
   0xe   :  { %60 = vmatpush.msra.mxu0 %v57_v1  ;;  %v50_v8 = vld [vmem:[#allocation5 + $0x38] sm:$0xff]  ;;  %v49_v9 = vld [vmem:[#allocation5 + $0x30] sm:$0xff]  ;;  %v48_v10 = vld [vmem:[#allocation5 + $0x28] sm:$0xff] }
   0xf   :  { %v47_v11 = vld [vmem:[#allocation5 + $0x20] sm:$0xff]  ;;  %v46_v12 = vld [vmem:[#allocation5 + $0x18] sm:$0xff]  ;;  %v45_v13 = vld [vmem:[#allocation5 + $0x10] sm:$0xff] }
  0x10   :  { %61 = vmatpush.msra.mxu0 %v56_v2  ;;  %v44_v14 = vld [vmem:[#allocation5 + $0x8] sm:$0xff]  ;;  %v43_v15 = vld [vmem:[#allocation5] sm:$0xff]  ;;  %v42_v16 = vld [vmem:[#allocation2] sm:$0xff] }
  0x12   :  { %62 = vmatpush.msra.mxu0 %v55_v3 }
  0x14   :  { %63 = vmatpush.msra.mxu0 %v54_v4 }
  0x16   :  { %64 = vmatpush.msra.mxu0 %v53_v5 }
  0x18   :  { %65 = vmatpush.msra.mxu0 %v52_v6 }
  0x1a   :  { %66 = vmatpush.msra.mxu0 %v51_v7 }
  0x1c   :  { %67 = vmatpush.msra.mxu0 %v50_v8 }
  0x1e   :  { %68 = vmatpush.msra.mxu0 %v49_v9 }
  0x20   :  { %69 = vmatpush.msra.mxu0 %v48_v10 }
  0x22   :  { %70 = vmatpush.msra.mxu0 %v47_v11 }
  0x24   :  { %71 = vmatpush.msra.mxu0 %v46_v12 }
  0x26   :  { %72 = vmatpush.msra.mxu0 %v45_v13 }
  0x28   :  { %73 = vmatpush.msra.mxu0 %v44_v14 }
  0x2a   :  { %74 = vmatpush.msra.mxu0 %v43_v15 }
  0x2b   :  { %75 = vmatmul.f32.vlgmr.msra.gmra.mxu0 %v42_v16 }
  0xa8   :  { %v76_v17 = vpop.f32.mrf.mxu0 }
  0xa9   :  { %79 = vst [vmem:[#allocation7] sm:$0xff] %v76_v17 }
  0xaa   :  { %90 = dma.vmem_to_hbm [thread:$0]  %s86_s1, 128, %s88_s23, [#allocation4]  }
  0xab   :  { %179 = dma.done.wait [#allocation4], 128  }
  0xac   :  { %180 = vsyncadd [#allocation4], 4294967168 }
  0xad   :  { %95 = vsyncpa [#allocation3], 1 }
  0xae   :  { %96 = vsyncpa [#allocation6], 1 }
  0xaf   :  { %97 = vsyncpa [#allocation4], 1 }

</bundles_post_ra>
